<compile_context>
chip_gen: v7x
topology: tpu7x:2x2x1
jax: 0.10.0
libtpu: 0.0.40
codegen_flags: <defaults>
</compile_context>

<pallas_src>
import jax
import jax.numpy as jnp
from jax.experimental import pallas as pl
from jax.experimental.pallas import tpu as pltpu


def _round_up(x, m):
    return (x + m - 1) // m * m


def _cdiv(a, b):
    return (a + b - 1) // b


# ---------------------------------------------------------------------------
# Hardware queries (with safe fallbacks).
# ---------------------------------------------------------------------------
def _vmem_capacity_bytes():
    try:
        return int(pltpu.get_tpu_info().vmem_capacity_bytes)
    except Exception:
        # Conservative fallback: true on v7x, under-estimates v5e/v6e (safe).
        return 64 * 1024 * 1024


def _num_tensorcores_per_chip():
    # v7x shards "parallel" grid axes across its 2 TensorCores; everywhere else
    # the grid is a serial loop on one core, so splitting only adds weight
    # re-streaming and we skip it.
    try:
        kind = jax.devices()[0].device_kind.lower()
    except Exception:
        return 1
    return 2 if ("v7" in kind or "7x" in kind) else 1


# ---------------------------------------------------------------------------
# Kernels.
# ---------------------------------------------------------------------------
def _fused_kernel(x_ref, w_ref, b_ref, o_ref, stage_ref, m_sc, l_sc):
    """Single-pass head: resident (tm, Vp) output, online log-softmax over vocab tiles.

    x_ref:     (tm, D)             activations, resident across vocab tiles
    w_ref:     (D, tv)             streamed vocab tile of the transposed weight
    b_ref:     (1, tv)   f32       bias tile (padded lanes hold -1e30)
    o_ref:     (tm, Vp)  out dtype output block, resident across vocab tiles
    stage_ref: (tm, Vp)  f32       raw-logit staging (f32 so the final LSE
                                   subtraction does not amplify bf16 rounding)
    m_sc/l_sc: (tm, 1)   f32       running max / running sum-exp
    """
    j = pl.program_id(1)
    nj = pl.num_programs(1)
    tv = w_ref.shape[1]

    @pl.when(j == 0)
    def _():
        m_sc[...] = jnp.full_like(m_sc, -jnp.inf)
        l_sc[...] = jnp.zeros_like(l_sc)

    # MXU matmul in native dtypes with f32 accumulation; bias add in f32.
    logits = jnp.dot(x_ref[...], w_ref[...], preferred_element_type=jnp.float32)
    logits = logits + b_ref[...]

    # Online max / sum-exp update (row reductions -> XLU, exp -> EUP).
    # Padded vocab lanes carry bias -1e30, so every tile has a finite max and
    # exp(m_prev - m_new) can never see (-inf) - (-inf).
    m_prev = m_sc[...]
    m_new = jnp.maximum(m_prev, jnp.max(logits, axis=-1, keepdims=True))
    l_sc[...] = l_sc[...] * jnp.exp(m_prev - m_new) + jnp.sum(
        jnp.exp(logits - m_new), axis=-1, keepdims=True)
    m_sc[...] = m_new

    # Stash raw f32 logits for this vocab tile into the resident staging block.
    start = pl.multiple_of(j * tv, 128)
    stage_ref[:, pl.ds(start, tv)] = logits

    # Finalize once per row tile: subtract the row LSE, cast a single time.
    @pl.when(j == nj - 1)
    def _():
        lse = m_sc[...] + jnp.log(l_sc[...])
        o_ref[...] = (stage_ref[...] - lse).astype(o_ref.dtype)


def _logits_lse_kernel(x_ref, w_ref, b_ref, logits_ref, lse_ref, m_sc, l_sc):
    """Split path, pass 1: stream raw f32 logit tiles + per-row log-sum-exp."""
    j = pl.program_id(1)
    nj = pl.num_programs(1)

    @pl.when(j == 0)
    def _():
        m_sc[...] = jnp.full_like(m_sc, -jnp.inf)
        l_sc[...] = jnp.zeros_like(l_sc)

    logits = jnp.dot(x_ref[...], w_ref[...], preferred_element_type=jnp.float32)
    logits = logits + b_ref[...]

    m_prev = m_sc[...]
    m_new = jnp.maximum(m_prev, jnp.max(logits, axis=-1, keepdims=True))
    l_sc[...] = l_sc[...] * jnp.exp(m_prev - m_new) + jnp.sum(
        jnp.exp(logits - m_new), axis=-1, keepdims=True)
    m_sc[...] = m_new

    logits_ref[...] = logits                    # (tm, tv) f32 block, index (i, j)

    @pl.when(j == nj - 1)
    def _():
        lse_ref[...] = m_sc[...] + jnp.log(l_sc[...])


def _normalize_kernel(logits_ref, lse_ref, o_ref):
    """Split path, pass 2: log_prob = logit - lse, cast once."""
    o_ref[...] = (logits_ref[...] - lse_ref[...]).astype(o_ref.dtype)


# ---------------------------------------------------------------------------
# Tiling helpers + parameter preparation (hoisted out of the per-call path).
# ---------------------------------------------------------------------------
def _choose_vocab_tile(V, tv_target):
    """Pick a lane-aligned vocab tile minimizing padding Vp - V (tie -> larger tv)."""
    tv_target = max(128, _round_up(tv_target, 128))
    v128 = _round_up(V, 128)
    best_tv, best_pad = 128, v128 - V
    tv = 128
    while tv <= min(tv_target, v128):
        pad = _round_up(V, tv) - V
        if pad < best_pad or (pad == best_pad and tv > best_tv):
            best_tv, best_pad = tv, pad
        tv += 128
    return best_tv, _round_up(V, best_tv)


def prepare_nlu_head_params(weight_t, bias, *, tv_target=512):
    """Pad the (D, V) weight / (V,) bias once, outside the per-step path.

    Padded vocab lanes get a -1e30 bias so they contribute nothing to the
    softmax max / sum-exp.  (Safe for f32/bf16 outputs; fp16/fp8 outputs would
    need an explicit lane mask instead.)
    """
    D, V = weight_t.shape
    tv, Vp = _choose_vocab_tile(V, tv_target)
    if Vp != V:
        wp = jnp.pad(weight_t, ((0, 0), (0, Vp - V)))
        bp = jnp.pad(bias.astype(jnp.float32), (0, Vp - V), constant_values=-1e30)
    else:
        wp = weight_t
        bp = bias.astype(jnp.float32)
    return {"weight": wp, "bias": bp.reshape(1, Vp), "tv": tv, "vocab_size": V}


# ---------------------------------------------------------------------------
# Forward pass.
# ---------------------------------------------------------------------------
def nlu_head_apply(encoder_output, params, *, tm_target=1024, fused_min_tm=512,
                   out_dtype=None, force_mode=None):
    """log_softmax(encoder_output @ W_t + b) over the last dim.

    encoder_output: (B, S, D);  params from prepare_nlu_head_params().
    Returns (B, S, V) log-probabilities.
    """
    wp, bp = params["weight"], params["bias"]
    tv, V = params["tv"], params["vocab_size"]
    B, S, D = encoder_output.shape
    Dw, Vp = wp.shape
    assert Dw == D, "weight must be (model_dim, vocab_size)"
    if out_dtype is None:
        out_dtype = encoder_output.dtype
    if force_mode not in (None, "fused", "split"):
        raise ValueError("force_mode must be None, 'fused' or 'split'")

    M = B * S
    x_b = jnp.dtype(encoder_output.dtype).itemsize
    w_b = jnp.dtype(wp.dtype).itemsize
    o_b = jnp.dtype(out_dtype).itemsize

    # --- per-generation VMEM budget (review: no hard 12 MiB cap) -------------
    cap = _vmem_capacity_bytes()
    vmem_limit = int(cap * 0.78)            # ~100 MiB v5e/v6e, ~50 MiB v7x
    tile_budget = int(vmem_limit * 0.9)     # headroom for compiler internals

    # --- row tile: as big as M / VMEM allow (weight-stream amortization) -----
    tm0 = _round_up(min(tm_target, M), 8)
    n_tc = _num_tensorcores_per_chip()
    if n_tc > 1 and _cdiv(M, tm0) < n_tc and M >= n_tc * 8:
        # v7x: make sure both TensorCores get at least one row tile.
        tm0 = _round_up(_cdiv(M, n_tc), 8)

    def fused_vmem(tm_):
        return (2 * tm_ * D * x_b          # x tile (double-buffered)
                + 2 * D * tv * w_b         # streamed weight tile
                + 2 * 8 * tv * 4           # bias tile (sublane-padded)
                + tm_ * Vp * 4             # f32 logit staging scratch (single)
                + 2 * tm_ * Vp * o_b       # resident output block
                + 4 * tm_ * 512)           # (tm,1) f32 scratches, lane-padded

    def split_vmem(tm_):
        return (2 * tm_ * D * x_b
                + 2 * D * tv * w_b
                + 2 * 8 * tv * 4
                + 2 * tm_ * tv * 4         # streamed f32 logits output block
                + 2 * tm_ * 512            # lse output block
                + 4 * tm_ * 512)

    def largest_fitting_tm(est):
        t = tm0
        while t > 8 and est(t) > tile_budget:
            t = max(8, _round_up(t // 2, 8))
        return t if est(t) <= tile_budget else 0

    if force_mode is not None:
        mode = force_mode
        tm = largest_fitting_tm(fused_vmem if mode == "fused" else split_vmem)
    else:
        tm_f = largest_fitting_tm(fused_vmem)
        tm_s = largest_fitting_tm(split_vmem)
        # Keep the single-pass resident-output kernel as long as it does not
        # force the row tile below the MXU roofline; otherwise drop the
        # full-vocab residency (large vocab on v7x's 64 MiB VMEM).
        if tm_f >= min(tm0, fused_min_tm):
            mode, tm = "fused", tm_f
        elif tm_s >= tm_f:
            mode, tm = "split", tm_s
        else:
            mode, tm = "fused", tm_f
    if tm == 0:
        raise ValueError("no tile configuration fits in the VMEM budget")

    # --- row padding only when tm does not divide M ---------------------------
    M_pad = _round_up(M, tm)
    x2d = encoder_output.reshape(M, D)
    if M_pad != M:
        x2d = jnp.pad(x2d, ((0, M_pad - M), (0, 0)))

    grid = (M_pad // tm, Vp // tv)
    n_row_tiles = grid[0]
    matmul_flops = 2 * M_pad * D * Vp
    weight_bytes = n_row_tiles * D * Vp * w_b   # weight re-streamed per row tile

    cparams = pltpu.CompilerParams(
        dimension_semantics=("parallel", "arbitrary"),
        vmem_limit_bytes=vmem_limit)

    if mode == "fused":
        cost = pl.CostEstimate(
            flops=int(matmul_flops),
            transcendentals=int(M_pad * Vp),
            bytes_accessed=int(M_pad * D * x_b + weight_bytes + M_pad * Vp * o_b))
        out = pl.pallas_call(
            _fused_kernel,
            out_shape=jax.ShapeDtypeStruct((M_pad, Vp), out_dtype),
            grid_spec=pltpu.PrefetchScalarGridSpec(
                num_scalar_prefetch=0,
                grid=grid,
                in_specs=[
                    pl.BlockSpec((tm, D), lambda i, j: (i, 0)),   # activations
                    pl.BlockSpec((D, tv), lambda i, j: (0, j)),   # weight tile
                    pl.BlockSpec((1, tv), lambda i, j: (0, j)),   # bias tile
                ],
                out_specs=pl.BlockSpec((tm, Vp), lambda i, j: (i, 0)),
                scratch_shapes=[
                    pltpu.VMEM((tm, Vp), jnp.float32),   # f32 logit staging
                    pltpu.VMEM((tm, 1), jnp.float32),    # running max
                    pltpu.VMEM((tm, 1), jnp.float32),    # running sum-exp
                ],
            ),
            compiler_params=cparams,
            cost_estimate=cost,
        )(x2d, wp, bp)
    else:
        cost_a = pl.CostEstimate(
            flops=int(matmul_flops),
            transcendentals=int(M_pad * Vp),
            bytes_accessed=int(M_pad * D * x_b + weight_bytes + M_pad * Vp * 4))
        logits, lse = pl.pallas_call(
            _logits_lse_kernel,
            out_shape=(jax.ShapeDtypeStruct((M_pad, Vp), jnp.float32),
                       jax.ShapeDtypeStruct((M_pad, 1), jnp.float32)),
            grid_spec=pltpu.PrefetchScalarGridSpec(
                num_scalar_prefetch=0,
                grid=grid,
                in_specs=[
                    pl.BlockSpec((tm, D), lambda i, j: (i, 0)),
                    pl.BlockSpec((D, tv), lambda i, j: (0, j)),
                    pl.BlockSpec((1, tv), lambda i, j: (0, j)),
                ],
                out_specs=[pl.BlockSpec((tm, tv), lambda i, j: (i, j)),
                           pl.BlockSpec((tm, 1), lambda i, j: (i, 0))],
                scratch_shapes=[pltpu.VMEM((tm, 1), jnp.float32),
                                pltpu.VMEM((tm, 1), jnp.float32)],
            ),
            compiler_params=cparams,
            cost_estimate=cost_a,
        )(x2d, wp, bp)

        cost_b = pl.CostEstimate(
            flops=int(M_pad * Vp),
            transcendentals=0,
            bytes_accessed=int(M_pad * Vp * (4 + o_b) + M_pad * 4))
        out = pl.pallas_call(
            _normalize_kernel,
            out_shape=jax.ShapeDtypeStruct((M_pad, Vp), out_dtype),
            grid_spec=pltpu.PrefetchScalarGridSpec(
                num_scalar_prefetch=0,
                grid=grid,
                in_specs=[pl.BlockSpec((tm, tv), lambda i, j: (i, j)),
                          pl.BlockSpec((tm, 1), lambda i, j: (i, 0))],
                out_specs=pl.BlockSpec((tm, tv), lambda i, j: (i, j)),
            ),
            compiler_params=pltpu.CompilerParams(
                dimension_semantics=("parallel", "parallel"),
                vmem_limit_bytes=vmem_limit),
            cost_estimate=cost_b,
        )(logits, lse)

    if M_pad != M or Vp != V:
        out = out[:M, :V]
    return out.reshape(B, S, V)


def nlu_head(encoder_output, weight_t, bias, *, tv_target=512, **kwargs):
    """Convenience wrapper: prepare (pad) params, then apply the head."""
    params = prepare_nlu_head_params(weight_t, bias, tv_target=tv_target)
    return nlu_head_apply(encoder_output, params, **kwargs)


# ---------------------------------------------------------------------------
# Reference + self-test.
# ---------------------------------------------------------------------------
def reference(encoder_output, weight_t, bias):
    logits = jnp.einsum("bsd,dv->bsv",
                        encoder_output.astype(jnp.float32),
                        weight_t.astype(jnp.float32)) + bias.astype(jnp.float32)
    return jax.nn.log_softmax(logits, axis=-1)


if __name__ == "__main__":
    key = jax.random.PRNGKey(0)

    def check(out, ref, name, atol=2e-4, rtol=2e-4):
        assert out.shape == ref.shape, (name, out.shape, ref.shape)
        err = jnp.max(jnp.abs(out.astype(jnp.float32) - ref))
        assert jnp.allclose(out.astype(jnp.float32), ref, atol=atol, rtol=rtol), (
            f"{name}: max abs err {err}")

    # Case 1: batch=2, seq=9, model_dim=32, vocab=300 — exercises vocab padding
    # (300 -> 384 lanes) and, with tv_target=128, the multi-vocab-tile online
    # log-softmax accumulation in both the fused and split paths.
    B, S, D, V = 2, 9, 32, 300
    k1, k2, k3, key = jax.random.split(key, 4)
    x = jax.random.normal(k1, (B, S, D), dtype=jnp.float32)
    # nn.Linear(D, V) weight is (V, D); stored transposed as (D, V).
    w_t = jax.random.normal(k2, (D, V), dtype=jnp.float32) * (D ** -0.5)
    b = jax.random.normal(k3, (V,), dtype=jnp.float32) * 0.01
    ref1 = reference(x, w_t, b)

    out_auto = jax.block_until_ready(nlu_head(x, w_t, b))
    check(out_auto, ref1, "case1/auto")
    out_fused = jax.block_until_ready(
        nlu_head(x, w_t, b, tv_target=128, force_mode="fused"))
    check(out_fused, ref1, "case1/fused")
    out_split = jax.block_until_ready(
        nlu_head(x, w_t, b, tv_target=128, force_mode="split"))
    check(out_split, ref1, "case1/split")

    # Case 2: multiple row tiles + row padding (M=150 rows, tm=64 -> 3 row
    # tiles, 150 -> 192 padded rows) with 4 vocab tiles (1000 -> 1024 lanes).
    B, S, D, V = 3, 50, 64, 1000
    k1, k2, k3, key = jax.random.split(key, 4)
    x = jax.random.normal(k1, (B, S, D), dtype=jnp.float32)
    w_t = jax.random.normal(k2, (D, V), dtype=jnp.float32) * (D ** -0.5)
    b = jax.random.normal(k3, (V,), dtype=jnp.float32) * 0.01
    ref2 = reference(x, w_t, b)

    out2 = jax.block_until_ready(
        nlu_head(x, w_t, b, tv_target=256, tm_target=64))
    check(out2, ref2, "case2/auto")
    out2s = jax.block_until_ready(
        nlu_head(x, w_t, b, tv_target=256, tm_target=64, force_mode="split"))
    check(out2s, ref2, "case2/split")

    print("KERNEL_OK")
</pallas_src>

<mosaic_0001>
module attributes {stable_mosaic.version = 11 : i64} {
  func.func @_fused_kernel(%arg0: i32, %arg1: i32, %arg2: memref<24x32xf32, #tpu.memory_space<vmem>>, %arg3: memref<32x384xf32, #tpu.memory_space<vmem>>, %arg4: memref<1x384xf32, #tpu.memory_space<vmem>>, %arg5: memref<24x384xf32, #tpu.memory_space<vmem>>, %arg6: memref<24x384xf32, #tpu.memory_space<vmem>>, %arg7: memref<24x1xf32, #tpu.memory_space<vmem>>, %arg8: memref<24x1xf32, #tpu.memory_space<vmem>>) attributes {dimension_semantics = [#tpu.dimension_semantics<parallel>, #tpu.dimension_semantics<arbitrary>], iteration_bounds = array<i64: 1, 1>, scalar_prefetch = 0 : i64, scratch_operands = 3 : i64, tpu.core_type = #tpu.core_type<tc>, window_params = [{transform_indices = @transform_0, window_bounds = array<i64: 24, 32>}, {transform_indices = @transform_1, window_bounds = array<i64: 32, 384>}, {transform_indices = @transform_2, window_bounds = array<i64: 1, 384>}, {transform_indices = @transform_3, window_bounds = array<i64: 24, 384>}]} {
    %c0_i32 = arith.constant 0 : i32
    %0 = arith.cmpi eq, %arg1, %c0_i32 : i32
    %1 = arith.extui %0 : i1 to i32
    %c0_i32_0 = arith.constant 0 : i32
    %2 = arith.cmpi ne, %1, %c0_i32_0 : i32
    scf.if %2 {
      %cst_19 = arith.constant 0xFF800000 : f32
      %32 = vector.broadcast %cst_19 : f32 to vector<24x1xf32>
      %c0_20 = arith.constant 0 : index
      %c0_21 = arith.constant 0 : index
      %33 = vector.load %arg7[%c0_20, %c0_21] : memref<24x1xf32, #tpu.memory_space<vmem>>, vector<24x1xf32>
      tpu.vector_store %arg7[%c0_20, %c0_21], %32 {strides = array<i32>} : memref<24x1xf32, #tpu.memory_space<vmem>>, vector<24x1xf32>,
      %cst_22 = arith.constant 0.000000e+00 : f32
      %34 = vector.broadcast %cst_22 : f32 to vector<24x1xf32>
      %c0_23 = arith.constant 0 : index
      %c0_24 = arith.constant 0 : index
      %35 = vector.load %arg8[%c0_23, %c0_24] : memref<24x1xf32, #tpu.memory_space<vmem>>, vector<24x1xf32>
      tpu.vector_store %arg8[%c0_23, %c0_24], %34 {strides = array<i32>} : memref<24x1xf32, #tpu.memory_space<vmem>>, vector<24x1xf32>,
    } else {
    }
    %c0 = arith.constant 0 : index
    %c0_1 = arith.constant 0 : index
    %3 = vector.load %arg2[%c0, %c0_1] : memref<24x32xf32, #tpu.memory_space<vmem>>, vector<24x32xf32>
    %c0_2 = arith.constant 0 : index
    %c0_3 = arith.constant 0 : index
    %4 = vector.load %arg3[%c0_2, %c0_3] : memref<32x384xf32, #tpu.memory_space<vmem>>, vector<32x384xf32>
    %cst = arith.constant dense<0.000000e+00> : vector<24x384xf32>
    %5 = tpu.matmul %3, %4, %cst {dimension_numbers = #tpu.dot_dimension_numbers<[1], [0], [0], [1], [0, 0, 1, 1], [], []>} : vector<24x32xf32>, vector<32x384xf32>, vector<24x384xf32> -> vector<24x384xf32>
    %c0_4 = arith.constant 0 : index
    %c0_5 = arith.constant 0 : index
    %6 = vector.load %arg4[%c0_4, %c0_5] : memref<1x384xf32, #tpu.memory_space<vmem>>, vector<1x384xf32>
    %7 = vector.broadcast %6 : vector<1x384xf32> to vector<24x384xf32>
    %8 = arith.addf %5, %7 : vector<24x384xf32>
    %c0_6 = arith.constant 0 : index
    %c0_7 = arith.constant 0 : index
    %9 = vector.load %arg7[%c0_6, %c0_7] : memref<24x1xf32, #tpu.memory_space<vmem>>, vector<24x1xf32>
    %cst_8 = arith.constant dense<0xFF800000> : vector<24xf32>
    %10 = vector.multi_reduction <maximumf>, %8, %cst_8 [1] : vector<24x384xf32> to vector<24xf32>
    %11 = vector.shape_cast %10 : vector<24xf32> to vector<24x1xf32>
    %12 = arith.maximumf %9, %11 : vector<24x1xf32>
    %c0_9 = arith.constant 0 : index
    %c0_10 = arith.constant 0 : index
    %13 = vector.load %arg8[%c0_9, %c0_10] : memref<24x1xf32, #tpu.memory_space<vmem>>, vector<24x1xf32>
    %14 = arith.subf %9, %12 : vector<24x1xf32>
    %15 = math.exp %14 : vector<24x1xf32>
    %16 = arith.mulf %13, %15 : vector<24x1xf32>
    %17 = vector.broadcast %12 : vector<24x1xf32> to vector<24x384xf32>
    %18 = arith.subf %8, %17 : vector<24x384xf32>
    %19 = math.exp %18 : vector<24x384xf32>
    %cst_11 = arith.constant dense<0.000000e+00> : vector<24xf32>
    %20 = vector.multi_reduction <add>, %19, %cst_11 [1] : vector<24x384xf32> to vector<24xf32>
    %21 = vector.shape_cast %20 : vector<24xf32> to vector<24x1xf32>
    %22 = arith.addf %16, %21 : vector<24x1xf32>
    %c0_12 = arith.constant 0 : index
    %c0_13 = arith.constant 0 : index
    %23 = vector.load %arg8[%c0_12, %c0_13] : memref<24x1xf32, #tpu.memory_space<vmem>>, vector<24x1xf32>
    tpu.vector_store %arg8[%c0_12, %c0_13], %22 {strides = array<i32>} : memref<24x1xf32, #tpu.memory_space<vmem>>, vector<24x1xf32>,
    %c0_14 = arith.constant 0 : index
    %c0_15 = arith.constant 0 : index
    %24 = vector.load %arg7[%c0_14, %c0_15] : memref<24x1xf32, #tpu.memory_space<vmem>>, vector<24x1xf32>
    tpu.vector_store %arg7[%c0_14, %c0_15], %12 {strides = array<i32>} : memref<24x1xf32, #tpu.memory_space<vmem>>, vector<24x1xf32>,
    %c384_i32 = arith.constant 384 : i32
    %25 = arith.muli %arg1, %c384_i32 : i32
    %26 = tpu.assume_multiple %25, 128 : i32
    %c0_16 = arith.constant 0 : index
    %27 = arith.index_cast %26 : i32 to index
    %28 = vector.load %arg6[%c0_16, %27] : memref<24x384xf32, #tpu.memory_space<vmem>>, vector<24x384xf32>
    tpu.vector_store %arg6[%c0_16, %27], %8 {strides = array<i32>} : memref<24x384xf32, #tpu.memory_space<vmem>>, vector<24x384xf32>,
    %c0_i32_17 = arith.constant 0 : i32
    %29 = arith.cmpi eq, %arg1, %c0_i32_17 : i32
    %30 = arith.extui %29 : i1 to i32
    %c0_i32_18 = arith.constant 0 : i32
    %31 = arith.cmpi ne, %30, %c0_i32_18 : i32
    scf.if %31 {
      %c0_19 = arith.constant 0 : index
      %c0_20 = arith.constant 0 : index
      %32 = vector.load %arg7[%c0_19, %c0_20] : memref<24x1xf32, #tpu.memory_space<vmem>>, vector<24x1xf32>
      %c0_21 = arith.constant 0 : index
      %c0_22 = arith.constant 0 : index
      %33 = vector.load %arg8[%c0_21, %c0_22] : memref<24x1xf32, #tpu.memory_space<vmem>>, vector<24x1xf32>
      %34 = math.log %33 : vector<24x1xf32>
      %35 = arith.addf %32, %34 : vector<24x1xf32>
      %c0_23 = arith.constant 0 : index
      %c0_24 = arith.constant 0 : index
      %36 = vector.load %arg6[%c0_23, %c0_24] : memref<24x384xf32, #tpu.memory_space<vmem>>, vector<24x384xf32>
      %37 = vector.broadcast %35 : vector<24x1xf32> to vector<24x384xf32>
      %38 = arith.subf %36, %37 : vector<24x384xf32>
      %c0_25 = arith.constant 0 : index
      %c0_26 = arith.constant 0 : index
      %39 = vector.load %arg5[%c0_25, %c0_26] : memref<24x384xf32, #tpu.memory_space<vmem>>, vector<24x384xf32>
      tpu.vector_store %arg5[%c0_25, %c0_26], %38 {strides = array<i32>} : memref<24x384xf32, #tpu.memory_space<vmem>>, vector<24x384xf32>,
    } else {
    }
    return
  }
  func.func @transform_0(%arg0: i32, %arg1: i32) -> (i32, i32) {
    %c0_i32 = arith.constant 0 : i32
    %c0_i32_0 = arith.constant 0 : i32
    return %arg0, %c0_i32 : i32, i32
  }
  func.func @transform_1(%arg0: i32, %arg1: i32) -> (i32, i32) {
    %c0_i32 = arith.constant 0 : i32
    %c0_i32_0 = arith.constant 0 : i32
    return %c0_i32, %arg1 : i32, i32
  }
  func.func @transform_2(%arg0: i32, %arg1: i32) -> (i32, i32) {
    %c0_i32 = arith.constant 0 : i32
    %c0_i32_0 = arith.constant 0 : i32
    return %c0_i32, %arg1 : i32, i32
  }
  func.func @transform_3(%arg0: i32, %arg1: i32) -> (i32, i32) {
    %c0_i32 = arith.constant 0 : i32
    %c0_i32_0 = arith.constant 0 : i32
    return %arg0, %c0_i32 : i32, i32
  }
}

</mosaic_0001>

<bundles_post_ra>
// kernel: tpu_custom_call.1
= control target key start
LH: loop header
LB: loop body
LE: loop exit
PB: predicated region body
PF: predicated region fallthrough
CT: control target
= control target key end

     0   :  { %8 = vsyncpa [#allocation6], 0  ;;  %s760_s0 = inlined_call_operand.hbm [shape: f32[24,32], index: 0, kind: input, shape index: {}]   ;;  %s761_s1 = inlined_call_operand.hbm [shape: f32[32,384], index: 1, kind: input, shape index: {}]   ;;  %s762_s2 = inlined_call_operand.vmem [shape: f32[1,384], index: 2, kind: input, shape index: {}]   ;;  %s763_s3 = inlined_call_operand.hbm [shape: f32[24,384], index: 3, kind: output, shape index: {}]  }
   0x1   :  { %9 = vsyncpa [#allocation9], 0 }
   0x2   :  { %10 = vsyncpa [#allocation7], 0  ;;  %s610_s12 = smov [#allocation5]   ;;  %s538_s16 = scalar_lea.hbm %s760_s0, 384 }
   0x3   :  { %s16_s13 = sshll.u32 %s610_s12, 4  ;;  %p539_p0 = scmp.ne.s32.totalorder %s760_s0, %s538_s16  ;;  %s17_s13 = int_to_ptr.vmem [resolvable:$true] %s16_s13 }
   0x4   :  { %p542_p1 = scmp.lt.u32.totalorder %s538_s16, %s760_s0 }
   0x6   :  { %p544_p2 = pnand %p542_p1, %p539_p0 }
   0x8   :  { %547 = shalt.err (!%p544_p2)
}
   0x9   :  { %s548_s21 = scalar_lea.vmem %s17_s13, 384  ;;  %p553_p4 = scmp.lt.s32.totalorder %s17_s13, %s17_s13 }
   0xa   :  { %p549_p3 = scmp.ne.s32.totalorder %s17_s13, %s548_s21  ;;  %p554_p5 = scmp.lt.s32.totalorder %s548_s21, %s548_s21 }
   0xc   :  { %p555_p6 = por %p554_p5, %p553_p4 }
   0xe   :  { %p556_p7 = pnand %p555_p6, %p549_p3 }
  0x10   :  { %559 = shalt.err (!%p556_p7)
}
  0x11   :  { %s611_s22 = smov 128   ;;  %s612_s23 = smov 8  }
  0x12   :  { %22 = dma.hbm_to_vmem [thread:$0]  %s760_s0, 384, %s17_s13, [#allocation6], %s611_s22, %s611_s22, %s612_s23  }
  0x13   :  { %s613_s26 = smov [#allocation8]   ;;  %s560_s30 = scalar_lea.hbm %s761_s1, 1536 }
  0x14   :  { %s28_s27 = sshll.u32 %s613_s26, 4  ;;  %p561_p8 = scmp.ne.s32.totalorder %s761_s1, %s560_s30  ;;  %s29_s27 = int_to_ptr.vmem [resolvable:$true] %s28_s27 }
  0x15   :  { %p564_p9 = scmp.lt.u32.totalorder %s560_s30, %s761_s1 }
  0x17   :  { %p566_p10 = pnand %p564_p9, %p561_p8 }
  0x19   :  { %569 = shalt.err (!%p566_p10)
}
  0x1a   :  { %s570_s8 = scalar_lea.vmem %s29_s27, 1536  ;;  %p575_p12 = scmp.lt.s32.totalorder %s29_s27, %s29_s27 }
  0x1b   :  { %p571_p11 = scmp.ne.s32.totalorder %s29_s27, %s570_s8  ;;  %p576_p13 = scmp.lt.s32.totalorder %s570_s8, %s570_s8 }
  0x1d   :  { %p577_p0 = por %p576_p13, %p575_p12 }
  0x1f   :  { %p578_p1 = pnand %p577_p0, %p571_p11 }
  0x21   :  { %581 = shalt.err (!%p578_p1)
}
  0x22   :  { %s614_s0 = smov 384   ;;  %s615_s9 = smov 24  }
  0x23   :  { %34 = dma.hbm_to_vmem [thread:$0]  %s761_s1, 1536, %s29_s27, [#allocation9], %s614_s0, %s614_s0, %s615_s9  }
  0x24   :  { %604 = dma.done.wait [#allocation6], 384  }
  0x25   :  { %605 = vsyncadd [#allocation6], 4294966912 }
  0x26   :  { %606 = dma.done.wait [#allocation9], 1536  }
  0x27   :  { %607 = vsyncadd [#allocation9], 4294965760  ;;  %v616_v0 = vmov 0.0|0.0   ;;  %vm617_vm0 = vmmov 0   ;;  %v618_v1 = vmov 0.0   ;;  %v58_v2 = vld [vmem:[#allocation8 + $0x8] sm:$0xff]  ;;  %v71_v24 = vlaneseq }
  0x28   :  { %488 = vmatprep.subr.bf16.mxu1 %v616_v0  ;;  %471 = vmatprep.mubr.msk.f32.mxu1 %vm617_vm0, %v618_v1  ;;  %v61_v3 = vld [vmem:[#allocation8 + $0x20] sm:$0xff]  ;;  %v59_v4 = vld [vmem:[#allocation8 + $0x10] sm:$0xff]  ;;  %v62_v6 = vld [vmem:[#allocation8 + $0x28] sm:$0xff]  ;;  %vm86_vm1 = vcmask 261120   ;;  %vm47_vm2 = vcmask 7168   ;;  %v619_v23 = vmov -inf  }
  0x29   :  { %160 = vmatprep.mubr.f32.mxu0 %v618_v1  ;;  %v480_v5 = vpack.c.bf16 %v61_v3, %v58_v2  ;;  %v57_v7 = vld [vmem:[#allocation8] sm:$0xff]  ;;  %v60_v8 = vld [vmem:[#allocation8 + $0x18] sm:$0xff]  ;;  %v489_v9 = vpack.c.bf16 %v62_v6, %v59_v4  ;;  %v67_v12 = vld [vmem:[#allocation8 + $0x50] sm:$0xff]  ;;  %48 = vst.msk [vmem:[#allocation3] sm:$0xff] %vm47_vm2, %v619_v23  ;;  %v72_v25 = vshrl.u32 %v71_v24, 7  ;;  %v620_v60 = vmov 0  }
  0x2a   :  { %v482_v10 = vpack.c.bf16 %v60_v8, %v57_v7  ;;  %v64_v11 = vld [vmem:[#allocation8 + $0x38] sm:$0xff]  ;;  %v65_v13 = vld [vmem:[#allocation8 + $0x40] sm:$0xff]  ;;  %v63_v16 = vld [vmem:[#allocation8 + $0x30] sm:$0xff]  ;;  %49 = vst.msk [vmem:[#allocation3 + $0x8] sm:$0xff] %vm47_vm2, %v619_v23  ;;  %506 = vset.pattern.permute.xlu1 %v620_v60  ;;  %507 = vset.pattern.permute.xlu0 %v620_v60 }
  0x2b   :  { %481 = vmatprep.subr.bf16.mxu0 %v480_v5  ;;  %v484_v14 = vpack.c.bf16 %v67_v12, %v64_v11  ;;  %v68_v15 = vld [vmem:[#allocation8 + $0x58] sm:$0xff]  ;;  %v66_v17 = vld [vmem:[#allocation8 + $0x48] sm:$0xff]  ;;  %490 = vmatpush3.bf16.msra.mxu1 %v489_v9  ;;  %v55_v21 = vld [vmem:[#allocation5 + $0x8] sm:$0xff]  ;;  %50 = vst.msk [vmem:[#allocation3 + $0x10] sm:$0xff] %vm47_vm2, %v619_v23  ;;  %v81_v26 = vsub.s32 2, %v72_v25  ;;  %v73_v27 = vsub.s32 0, %v72_v25 }
  0x2c   :  { %483 = vmatpush1.bf16.msra.mxu0 %v482_v10  ;;  %v492_v18 = vpack.c.bf16 %v68_v15, %v65_v13  ;;  %v486_v19 = vpack.c.bf16 %v66_v17, %v63_v16  ;;  %491 = vmatprep.subr.bf16.mxu1 %v616_v0  ;;  %v54_v20 = vld [vmem:[#allocation5] sm:$0xff]  ;;  %v56_v22 = vld [vmem:[#allocation5 + $0x10] sm:$0xff]  ;;  %51 = vst.msk [vmem:[#allocation4] sm:$0xff] %vm47_vm2, %v618_v1  ;;  %52 = vst.msk [vmem:[#allocation4 + $0x8] sm:$0xff] %vm47_vm2, %v618_v1  ;;  %v77_v29 = vsub.s32 1, %v72_v25 }
  0x2d   :  { %485 = vmatprep.subr.bf16.mxu0 %v484_v14  ;;  %53 = vst.msk [vmem:[#allocation4 + $0x10] sm:$0xff] %vm47_vm2, %v618_v1  ;;  %v69_v28 = vld [vmem:[%s762_s2] sm:$0x7]  ;;  %s621_s2 = smov [#allocation10]  }
  0x2e   :  { %v82_v30 = vrot.slane %v69_v28, %v81_v26  ;;  %v74_v31 = vrot.slane %v69_v28, %v73_v27  ;;  %v78_v32 = vrot.slane %v69_v28, %v77_v29  ;;  %s435_s13 = sshll.u32 %s621_s2, 4  ;;  %s436_s13 = int_to_ptr.vmem [resolvable:$true] %s435_s13 }
  0x2f   :  { %493 = vmatpush3.bf16.msra.mxu1 %v492_v18  ;;  %s582_s14 = scalar_lea.vmem %s436_s13, 1152  ;;  %p587_p3 = scmp.lt.s32.totalorder %s436_s13, %s436_s13 }
  0x30   :  { %487 = vmatpush1.bf16.msra.mxu0 %v486_v19  ;;  %v708_v61 = vld [vmem:[#allocation3] sm:$0xff]  ;;  %p583_p2 = scmp.ne.s32.totalorder %s436_s13, %s582_s14  ;;  %p588_p4 = scmp.lt.s32.totalorder %s582_s14, %s582_s14 }
  0x31   :  { %v713_v0 = vld [vmem:[#allocation3 + $0x8] sm:$0xff] }
  0x32   :  { %472 = vmatmul.mubr.msk.f32.vlgmr.msra.gmra.mrb[0].mxu1 %vm86_vm1, %v54_v20  ;;  %v261_v4 = vld [vmem:[#allocation3 + $0x10] sm:$0xff]  ;;  %p589_p5 = por %p588_p4, %p587_p3 }
  0x33   :  { %450 = vmatmul.mubr.msk.f32.vlgmr.msra.gmra.mrb[0].mxu0 %vm86_vm1, %v54_v20  ;;  %474 = vmatprep.mubr.msk.f32.mxu1 %vm617_vm0, %v618_v1 }
  0x34   :  { %166 = vmatprep.mubr.f32.mxu0 %v618_v1  ;;  %p590_p6 = pnand %p589_p5, %p583_p2 }
  0x36   :  { %475 = vmatmul.mubr.msk.f32.gmra.mrb[2].mxu1 %vm86_vm1, %v55_v21 }
  0x37   :  { %451 = vmatmul.mubr.msk.f32.gmra.mrb[2].mxu0 %vm86_vm1, %v55_v21  ;;  %477 = vmatprep.mubr.msk.f32.mxu1 %vm617_vm0, %v618_v1 }
  0x38   :  { %172 = vmatprep.mubr.f32.mxu0 %v618_v1 }
  0x3a   :  { %478 = vmatmul.mubr.msk.f32.gmra.mrb[4].mxu1 %vm86_vm1, %v56_v22 }
  0x3b   :  { %452 = vmatmul.mubr.msk.f32.gmra.mrb[4].mxu0 %vm86_vm1, %v56_v22 }
 0x105   :  { %v245_v33 = vpop.f32.mrb[0].mxu1 }
 0x106   :  { %v162_v34 = vpop.f32.mrb[0].mxu0  ;;  %v681_v35 = vadd.f32 %v245_v33, %v82_v30  ;;  %v473_v37 = vpop.f32.mrb[1].mxu1 }
 0x107   :  { %v683_v36 = vadd.f32 %v162_v34, %v74_v31  ;;  %v164_v38 = vpop.f32.mrb[1].mxu0 }
 0x108   :  { %v685_v39 = vadd.f32 %v164_v38, %v78_v32 }
 0x109   :  { %v262_v40 = vmax.f32 %v683_v36, %v681_v35  ;;  %v250_v41 = vpop.f32.mrb[2].mxu1 }
 0x10a   :  { %v168_v42 = vpop.f32.mrb[2].mxu0  ;;  %v689_v43 = vadd.f32 %v250_v41, %v82_v30  ;;  %v476_v45 = vpop.f32.mrb[3].mxu1 }
 0x10b   :  { %v691_v44 = vadd.f32 %v168_v42, %v74_v31  ;;  %v170_v46 = vpop.f32.mrb[3].mxu0  ;;  %v263_v47 = vmax.f32 %v262_v40, %v685_v39 }
 0x10c   :  { %v694_v48 = vadd.f32 %v170_v46, %v78_v32 }
 0x10d   :  { %264 = vmax.xlane.f32.xlu0 %v263_v47  ;;  %v266_v49 = vmax.f32 %v691_v44, %v689_v43  ;;  %v255_v50 = vpop.f32.mrb[4].mxu1 }
 0x10e   :  { %v174_v51 = vpop.f32.mrb[4].mxu0  ;;  %v698_v52 = vadd.f32 %v255_v50, %v82_v30  ;;  %v479_v54 = vpop.f32.mrb[5].mxu1 }
 0x10f   :  { %v700_v53 = vadd.f32 %v174_v51, %v74_v31  ;;  %v176_v55 = vpop.f32.mrb[5].mxu0  ;;  %v267_v56 = vmax.f32 %v266_v49, %v694_v48 }
 0x110   :  { %v703_v57 = vadd.f32 %v176_v55, %v78_v32 }
 0x111   :  { %268 = vmax.xlane.f32.xlu0 %v267_v56  ;;  %v270_v58 = vmax.f32 %v700_v53, %v698_v52 }
 0x113   :  { %v271_v59 = vmax.f32 %v270_v58, %v703_v57  ;;  %v277_v58 = vld [vmem:[#allocation4] sm:$0xff] }
 0x115   :  { %272 = vmax.xlane.f32.xlu1 %v271_v59 }
 0x19a   :  { %v265_v62 = vpop.xlane.xlu0 %264 }
 0x19b   :  { %v711_v63 = vmax.f32 %v708_v61, %v265_v62  ;;  %v278_v62 = vld [vmem:[#allocation4 + $0x8] sm:$0xff] }
 0x19d   :  { %v280_v1 = vsub.f32 %v708_v61, %v711_v63  ;;  %353 = vst.msk [vmem:[#allocation3] sm:$0xff] %vm47_vm2, %v711_v63  ;;  %294 = vperm.xlu1 %506, %v711_v63  }
 0x19e   :  { %v269_v2 = vpop.xlane.xlu0 %268 }
 0x19f   :  { %v275_v3 = vmax.f32 %v713_v0, %v269_v2  ;;  %v283_v51 = vmul.f32 1.442695, %v280_v1 }
 0x1a1   :  { %v281_v5 = vsub.f32 %v713_v0, %v275_v3  ;;  %354 = vst.msk [vmem:[#allocation3 + $0x8] sm:$0xff] %vm47_vm2, %v275_v3  ;;  %299 = vperm.xlu0 %507, %v275_v3  }
 0x1a2   :  { %v273_v6 = vpop.xlane.xlu1 %272 }
 0x1a3   :  { %v276_v7 = vmax.f32 %v261_v4, %v273_v6  ;;  %v285_v54 = vmul.f32 1.442695, %v281_v5 }
 0x1a5   :  { %v282_v8 = vsub.f32 %v261_v4, %v276_v7  ;;  %355 = vst.msk [vmem:[#allocation3 + $0x10] sm:$0xff] %vm47_vm2, %v276_v7  ;;  %304 = vperm.xlu1 %506, %v276_v7   ;;  %v279_v4 = vld [vmem:[#allocation4 + $0x10] sm:$0xff] }
 0x1a7   :  { %v287_v55 = vmul.f32 1.442695, %v282_v8 }
 0x21c   :  { %v295_v9 = vpop.permute.xlu1 %294 }
 0x21d   :  { %v307_v10 = vsub.f32 %v683_v36, %v295_v9  ;;  %v308_v11 = vsub.f32 %v685_v39, %v295_v9  ;;  %v309_v12 = vsub.f32 %v681_v35, %v295_v9 }
 0x21f   :  { %v316_v13 = vmul.f32 1.442695, %v307_v10  ;;  %v318_v14 = vmul.f32 1.442695, %v308_v11  ;;  %v320_v15 = vmul.f32 1.442695, %v309_v12 }
 0x220   :  { %v300_v16 = vpop.permute.xlu0 %299 }
 0x221   :  { %508 = vpow2.f32 %v316_v13  ;;  %v310_v17 = vsub.f32 %v691_v44, %v300_v16  ;;  %v311_v18 = vsub.f32 %v694_v48, %v300_v16  ;;  %v312_v19 = vsub.f32 %v689_v43, %v300_v16  ;;  %v373_v13 = vld [vmem:[#allocation3] sm:$0xff] }
 0x222   :  { %510 = vpow2.f32 %v318_v14 }
 0x223   :  { %v322_v20 = vmul.f32 1.442695, %v310_v17  ;;  %v324_v21 = vmul.f32 1.442695, %v311_v18  ;;  %512 = vpow2.f32 %v320_v15  ;;  %v326_v22 = vmul.f32 1.442695, %v312_v19 }
 0x224   :  { %v305_v23 = vpop.permute.xlu1 %304  ;;  %v374_v17 = vld [vmem:[#allocation3 + $0x8] sm:$0xff] }
 0x225   :  { %514 = vpow2.f32 %v322_v20  ;;  %v313_v24 = vsub.f32 %v700_v53, %v305_v23  ;;  %v314_v25 = vsub.f32 %v703_v57, %v305_v23  ;;  %v315_v26 = vsub.f32 %v698_v52, %v305_v23 }
 0x226   :  { %516 = vpow2.f32 %v324_v21  ;;  %v375_v21 = vld [vmem:[#allocation3 + $0x10] sm:$0xff] }
 0x227   :  { %v328_v27 = vmul.f32 1.442695, %v313_v24  ;;  %v330_v28 = vmul.f32 1.442695, %v314_v25  ;;  %518 = vpow2.f32 %v326_v22  ;;  %v332_v29 = vmul.f32 1.442695, %v315_v26 }
 0x229   :  { %520 = vpow2.f32 %v328_v27 }
 0x22a   :  { %522 = vpow2.f32 %v330_v28 }
 0x22b   :  { %v509_v30 = vpop.eup %508  ;;  %524 = vpow2.f32 %v332_v29 }
 0x22c   :  { %v511_v31 = vpop.eup %510  ;;  %526 = vpow2.f32 %v283_v51 }
 0x22d   :  { %v334_v32 = vadd.f32 %v511_v31, %v509_v30  ;;  %v513_v33 = vpop.eup %512  ;;  %528 = vpow2.f32 %v285_v54 }
 0x22e   :  { %530 = vpow2.f32 %v287_v55 }
 0x22f   :  { %v515_v34 = vpop.eup %514  ;;  %v335_v37 = vadd.f32 %v513_v33, %v334_v32 }
 0x230   :  { %v517_v38 = vpop.eup %516 }
 0x231   :  { %336 = vadd.xlane.f32.xlu1 %v335_v37  ;;  %v338_v40 = vadd.f32 %v517_v38, %v515_v34  ;;  %v519_v41 = vpop.eup %518 }
 0x233   :  { %v521_v42 = vpop.eup %520  ;;  %v339_v45 = vadd.f32 %v519_v41, %v338_v40 }
 0x234   :  { %v523_v46 = vpop.eup %522 }
 0x235   :  { %340 = vadd.xlane.f32.xlu0 %v339_v45  ;;  %v342_v47 = vadd.f32 %v523_v46, %v521_v42  ;;  %v525_v49 = vpop.eup %524 }
 0x236   :  { %v527_v56 = vpop.eup %526 }
 0x237   :  { %v343_v50 = vadd.f32 %v525_v49, %v342_v47  ;;  %v289_v59 = vmul.f32 %v527_v56, %v277_v58  ;;  %v529_v60 = vpop.eup %528 }
 0x238   :  { %v290_v0 = vmul.f32 %v529_v60, %v278_v62  ;;  %v531_v2 = vpop.eup %530 }
 0x239   :  { %344 = vadd.xlane.f32.xlu1 %v343_v50  ;;  %v291_v1 = vmul.f32 %v531_v2, %v279_v4 }
 0x2be   :  { %v337_v61 = vpop.xlane.xlu1 %336 }
 0x2bf   :  { %v346_v63 = vadd.f32 %v337_v61, %v289_v59 }
 0x2c1   :  { %350 = vst.msk [vmem:[#allocation4] sm:$0xff] %vm47_vm2, %v346_v63 }
 0x2c2   :  { %v341_v3 = vpop.xlane.xlu0 %340 }
 0x2c3   :  { %v347_v6 = vadd.f32 %v341_v3, %v290_v0 }
 0x2c5   :  { %351 = vst.msk [vmem:[#allocation4 + $0x8] sm:$0xff] %vm47_vm2, %v347_v6 }
 0x2c6   :  { %v345_v5 = vpop.xlane.xlu1 %344 }
 0x2c7   :  { %v348_v7 = vadd.f32 %v345_v5, %v291_v1 }
 0x2c8   :  { %v376_v8 = vld [vmem:[#allocation4] sm:$0xff] }
 0x2c9   :  { %352 = vst.msk [vmem:[#allocation4 + $0x10] sm:$0xff] %vm47_vm2, %v348_v7  ;;  %532 = vlog2.f32 %v376_v8 }
 0x2cc   :  { %v377_v9 = vld [vmem:[#allocation4 + $0x8] sm:$0xff] }
 0x2cd   :  { %534 = vlog2.f32 %v377_v9 }
 0x2d0   :  { %v378_v10 = vld [vmem:[#allocation4 + $0x10] sm:$0xff] }
 0x2d1   :  { %536 = vlog2.f32 %v378_v10 }
 0x2d3   :  { %v533_v11 = vpop.eup %532 }
 0x2d4   :  { %v380_v12 = vmul.f32 0.6931472, %v533_v11 }
 0x2d6   :  { %v385_v14 = vadd.f32 %v380_v12, %v373_v13 }
 0x2d7   :  { %v535_v15 = vpop.eup %534 }
 0x2d8   :  { %399 = vperm.xlu1 %506, %v385_v14   ;;  %v382_v16 = vmul.f32 0.6931472, %v535_v15 }
 0x2da   :  { %v386_v18 = vadd.f32 %v382_v16, %v374_v17 }
 0x2db   :  { %v537_v19 = vpop.eup %536 }
 0x2dc   :  { %404 = vperm.xlu1 %506, %v386_v18   ;;  %v384_v20 = vmul.f32 0.6931472, %v537_v19 }
 0x2de   :  { %v387_v22 = vadd.f32 %v384_v20, %v375_v21 }
 0x2e0   :  { %409 = vperm.xlu0 %507, %v387_v22  }
 0x357   :  { %v400_v23 = vpop.permute.xlu1 %399 }
 0x358   :  { %v412_v24 = vsub.f32 %v683_v36, %v400_v23  ;;  %v413_v25 = vsub.f32 %v685_v39, %v400_v23  ;;  %v414_v26 = vsub.f32 %v681_v35, %v400_v23 }
 0x35a   :  { %421 = vst [vmem:[#allocation10] sm:$0xff] %v412_v24  ;;  %422 = vst [vmem:[#allocation10 + $0x8] sm:$0xff] %v413_v25 }
 0x35b   :  { %423 = vst [vmem:[#allocation10 + $0x10] sm:$0xff] %v414_v26  ;;  %v405_v27 = vpop.permute.xlu1 %404 }
 0x35c   :  { %v415_v28 = vsub.f32 %v691_v44, %v405_v27  ;;  %v416_v29 = vsub.f32 %v694_v48, %v405_v27  ;;  %v417_v30 = vsub.f32 %v689_v43, %v405_v27 }
 0x35e   :  { %424 = vst [vmem:[#allocation10 + $0x18] sm:$0xff] %v415_v28  ;;  %425 = vst [vmem:[#allocation10 + $0x20] sm:$0xff] %v416_v29 }
 0x35f   :  { %426 = vst [vmem:[#allocation10 + $0x28] sm:$0xff] %v417_v30  ;;  %v410_v36 = vpop.permute.xlu0 %409 }
 0x360   :  { %v418_v39 = vsub.f32 %v700_v53, %v410_v36  ;;  %v419_v35 = vsub.f32 %v703_v57, %v410_v36  ;;  %v420_v31 = vsub.f32 %v698_v52, %v410_v36 }
 0x362   :  { %427 = vst [vmem:[#allocation10 + $0x30] sm:$0xff] %v418_v39  ;;  %428 = vst [vmem:[#allocation10 + $0x38] sm:$0xff] %v419_v35 }
 0x363   :  { %429 = vst [vmem:[#allocation10 + $0x40] sm:$0xff] %v420_v31 }
 0x364   :  { %593 = shalt.err (!%p590_p6)
}
 0x365   :  { %s594_s17 = scalar_lea.hbm %s763_s3, 1152 }
 0x366   :  { %p595_p7 = scmp.ne.s32.totalorder %s763_s3, %s594_s17  ;;  %p598_p8 = scmp.lt.u32.totalorder %s594_s17, %s763_s3 }
 0x368   :  { %p600_p9 = pnand %p598_p8, %p595_p7 }
 0x36a   :  { %603 = shalt.err (!%p600_p9)
}
 0x36b   :  { %441 = dma.vmem_to_hbm [thread:$0]  %s436_s13, 1152, %s763_s3, [#allocation7], %s614_s0, %s614_s0, %s615_s9  }
 0x36c   :  { %608 = dma.done.wait [#allocation7], 1152  }
 0x36d   :  { %609 = vsyncadd [#allocation7], 4294966144 }
 0x36e   :  { %445 = vsyncpa [#allocation6], 1 }
 0x36f   :  { %446 = vsyncpa [#allocation9], 1 }
 0x370   :  { %447 = vsyncpa [#allocation7], 1 }

</bundles_post_ra>
